<compile_context>
chip_gen: v7x
topology: tpu7x:2x2x1
jax: 0.10.0
libtpu: 0.0.40
codegen_flags: <defaults>
</compile_context>

<pallas_src>
import functools

import jax
import jax.numpy as jnp
from jax.experimental import pallas as pl
from jax.experimental.pallas import tpu as pltpu

NUM_KEYPOINTS = 17
SIMCC_SPLIT = 2  # simcc bins = input spatial size * split ratio


# -----------------------------------------------------------------------------
# Tiled matmul + bias (+ optional ReLU):  C = act(A @ B + bias)
# -----------------------------------------------------------------------------
def _matmul_bias_kernel(a_ref, b_ref, bias_ref, o_ref, acc_ref, *, relu):
    @pl.when(pl.program_id(2) == 0)
    def _():
        acc_ref[...] = jnp.zeros_like(acc_ref)

    lhs = a_ref[...]
    rhs = b_ref[...]
    if rhs.dtype == jnp.bfloat16 and lhs.dtype != jnp.bfloat16:
        lhs = lhs.astype(jnp.bfloat16)  # bf16 x bf16 MXU pass, f32 accumulate
    acc_ref[...] += jnp.dot(lhs, rhs, preferred_element_type=jnp.float32)

    @pl.when(pl.program_id(2) == pl.num_programs(2) - 1)
    def _():
        out = acc_ref[...] + bias_ref[...]
        if relu:
            out = jnp.maximum(out, 0.0)
        o_ref[...] = out.astype(o_ref.dtype)


def _tile(dim, tile):
    """Return (block, grid).  Small dims stay full-extent (no padding)."""
    if dim <= tile:
        return dim, 1
    return tile, pl.cdiv(dim, tile)


def matmul_bias(a, b, bias, *, relu=False, tm=256, tn=512, tk=512):
    """act(A @ B + bias); A:[M,K], B:[K,N] (f32 or bf16), bias:[N] -> f32 [M,N]."""
    M, K = a.shape
    Kb, N = b.shape
    assert K == Kb
    bm, gm = _tile(M, tm)
    bn, gn = _tile(N, tn)
    bk, gk = _tile(K, tk)
    Mp, Np, Kp = bm * gm, bn * gn, bk * gk
    if (Mp, Kp) != (M, K):
        a = jnp.pad(a, ((0, Mp - M), (0, Kp - K)))
    if (Kp, Np) != (K, N):
        b = jnp.pad(b, ((0, Kp - K), (0, Np - N)))
    bias2 = bias.reshape(1, N).astype(jnp.float32)
    if Np != N:
        bias2 = jnp.pad(bias2, ((0, 0), (0, Np - N)))

    out = pl.pallas_call(
        functools.partial(_matmul_bias_kernel, relu=relu),
        out_shape=jax.ShapeDtypeStruct((Mp, Np), jnp.float32),
        grid=(gm, gn, gk),
        in_specs=[
            pl.BlockSpec((bm, bk), lambda i, j, k: (i, k)),
            pl.BlockSpec((bk, bn), lambda i, j, k: (k, j)),
            pl.BlockSpec((1, bn), lambda i, j, k: (0, j)),
        ],
        out_specs=pl.BlockSpec((bm, bn), lambda i, j, k: (i, j)),
        scratch_shapes=[pltpu.VMEM((bm, bn), jnp.float32)],
        compiler_params=pltpu.CompilerParams(
            dimension_semantics=("parallel", "parallel", "arbitrary")),
    )(a, b, bias2)
    if (Mp, Np) != (M, N):
        out = out[:M, :N]
    return out


# -----------------------------------------------------------------------------
# Stem conv (3x3, stride 2, Cin=3): im2col here is cheap (3 channels) + tiled GEMM
# -----------------------------------------------------------------------------
def _im2col(x, kh, kw, stride, pad):
    B, H, W, C = x.shape
    xp = jnp.pad(x, ((0, 0), (pad, pad), (pad, pad), (0, 0)))
    OH = (H + 2 * pad - kh) // stride + 1
    OW = (W + 2 * pad - kw) // stride + 1
    taps = [xp[:, i:i + stride * OH:stride, j:j + stride * OW:stride, :]
            for i in range(kh) for j in range(kw)]
    return jnp.stack(taps, axis=3), OH, OW


def stem_conv(x, w, b):
    KH, KW, Cin, Cout = w.shape
    patches, OH, OW = _im2col(x, KH, KW, stride=2, pad=1)
    B = x.shape[0]
    a = patches.reshape(B * OH * OW, KH * KW * Cin)
    out = matmul_bias(a, w.reshape(KH * KW * Cin, Cout), b, relu=True)
    return out.reshape(B, OH, OW, Cout)


# -----------------------------------------------------------------------------
# Fused depthwise-3x3 (+ReLU) -> 1x1 pointwise (+ReLU) -> optional 1x1 head conv
# -----------------------------------------------------------------------------
def _dw_pw_kernel(x_ref, dw_w_ref, dw_b_ref, pw_w_ref, pw_b_ref, *rest,
                  taps, fuse_head):
    if fuse_head:
        head_w_ref, head_b_ref, o_ref = rest
    else:
        (o_ref,) = rest
    _, RC, OW, _ = o_ref.shape
    C = dw_w_ref.shape[1]

    # Depthwise 3x3 = 9 shifted multiply-adds on the halo'd tile (no im2col).
    acc = jnp.zeros((RC, OW, C), jnp.float32)
    for t, (r0, c0) in enumerate(taps):          # static unroll over 9 taps
        win = x_ref[0, pl.ds(r0, RC), pl.ds(c0, OW), :]
        acc = acc + win * dw_w_ref[t:t + 1, :]
    acc = jnp.maximum(acc + dw_b_ref[...], 0.0)  # BN folded into bias; ReLU

    # Fused 1x1 pointwise conv on the MXU (+ReLU).
    h = acc.reshape(RC * OW, C)
    h = jnp.dot(h, pw_w_ref[...], preferred_element_type=jnp.float32) + pw_b_ref[...]
    h = jnp.maximum(h, 0.0)

    if fuse_head:                                # fused 1x1 head conv (no activation)
        h = jnp.dot(h, head_w_ref[...], preferred_element_type=jnp.float32)
        h = h + head_b_ref[...]

    o_ref[0] = h.reshape(RC, OW, -1).astype(o_ref.dtype)


def dw_pw_block(x, dw_w, dw_b, pw_w, pw_b, *, stride, head_w=None, head_b=None,
                row_chunk=16):
    """Fused depthwise(3x3, pad=1) -> pointwise(1x1) [-> head 1x1] pallas_call.

    Stride-2 depthwise is handled by splitting the padded input into its 4
    spatial parity planes in the wrapper (same total bytes as the input), so the
    kernel only performs static stride-1 slices.  Output rows are chunked
    (halo = 1-2 rows per chunk) to bound VMEM on every TPU generation.
    """
    B, H, W, C = x.shape
    pad = 1
    assert stride in (1, 2)
    OH = (H + 2 * pad - 3) // stride + 1
    OW = (W + 2 * pad - 3) // stride + 1
    C1 = pw_w.shape[-1]
    Cout = C1 if head_w is None else head_w.shape[-1]

    xp = jnp.pad(x, ((0, 0), (pad, pad), (pad, pad), (0, 0)))
    if stride == 1:
        planes = xp[:, None]                               # [B, 1, H+2, W+2, C]
        win = 3
        PW = W + 2
        tap_list = [(0, di, dj) for di in range(3) for dj in range(3)]
    else:
        assert H % 2 == 0 and W % 2 == 0
        planes = jnp.stack(
            [xp[:, pr::2, pc::2, :][:, :OH + 1, :OW + 1, :]
             for pr in range(2) for pc in range(2)], axis=1)  # [B, 4, OH+1, OW+1, C]
        win = 2
        PW = OW + 1
        tap_list = [((di % 2) * 2 + (dj % 2), di // 2, dj // 2)
                    for di in range(3) for dj in range(3)]
    P = planes.shape[1]

    RC = min(row_chunk, OH)
    nh = pl.cdiv(OH, RC)
    OH_pad = nh * RC
    IHc = RC + win - 1
    need_rows = OH_pad + win - 1
    if need_rows > planes.shape[2]:
        planes = jnp.pad(planes, ((0, 0), (0, 0),
                                  (0, need_rows - planes.shape[2]), (0, 0), (0, 0)))
    chunks = jnp.stack([planes[:, :, q * RC:q * RC + IHc] for q in range(nh)], axis=1)
    xc = chunks.reshape(B * nh, P * IHc, PW, C)  # planes folded into leading rows

    taps = tuple((pli * IHc + r, c) for (pli, r, c) in tap_list)
    fuse_head = head_w is not None
    kernel = functools.partial(_dw_pw_kernel, taps=taps, fuse_head=fuse_head)

    in_specs = [
        pl.BlockSpec((1, P * IHc, PW, C), lambda q: (q, 0, 0, 0)),
        pl.BlockSpec((9, C), lambda q: (0, 0)),
        pl.BlockSpec((1, C), lambda q: (0, 0)),
        pl.BlockSpec((C, C1), lambda q: (0, 0)),
        pl.BlockSpec((1, C1), lambda q: (0, 0)),
    ]
    args = [xc, dw_w.reshape(9, C), dw_b.reshape(1, C),
            pw_w.reshape(C, C1), pw_b.reshape(1, C1)]
    if fuse_head:
        in_specs += [pl.BlockSpec((C1, Cout), lambda q: (0, 0)),
                     pl.BlockSpec((1, Cout), lambda q: (0, 0))]
        args += [head_w.reshape(C1, Cout), head_b.reshape(1, Cout)]

    out = pl.pallas_call(
        kernel,
        out_shape=jax.ShapeDtypeStruct((B * nh, RC, OW, Cout), jnp.float32),
        grid=(B * nh,),
        in_specs=in_specs,
        out_specs=pl.BlockSpec((1, RC, OW, Cout), lambda q: (q, 0, 0, 0)),
        compiler_params=pltpu.CompilerParams(dimension_semantics=("parallel",)),
    )(*args)
    out = out.reshape(B, OH_pad, OW, Cout)
    if OH_pad != OH:
        out = out[:, :OH]
    return out


# -----------------------------------------------------------------------------
# Model: parameters + forward
# -----------------------------------------------------------------------------
def init_params(key, in_hw):
    H, W = in_hw
    feat_hw = (H // 4) * (W // 4)            # stem s2 + dw1 s2
    dx, dy = W * SIMCC_SPLIT, H * SIMCC_SPLIT
    ks = jax.random.split(key, 8)

    def w(k, shape, fan_in):
        return jax.random.normal(k, shape, jnp.float32) / jnp.sqrt(float(fan_in))

    p = {
        # backbone (BN folded into conv bias)
        "stem_w": w(ks[0], (3, 3, 3, 16), 27), "stem_b": jnp.full((16,), 0.01, jnp.float32),
        "dw1_w": w(ks[1], (3, 3, 16), 9),      "dw1_b": jnp.full((16,), 0.01, jnp.float32),
        "pw1_w": w(ks[2], (16, 32), 16),       "pw1_b": jnp.full((32,), 0.01, jnp.float32),
        "dw2_w": w(ks[3], (3, 3, 32), 9),      "dw2_b": jnp.full((32,), 0.01, jnp.float32),
        "pw2_w": w(ks[4], (32, 32), 32),       "pw2_b": jnp.full((32,), 0.01, jnp.float32),
        # head: 1x1 conv to keypoint channels + fused SimCC FC (x || y), bf16 weights
        "head_w": w(ks[5], (32, NUM_KEYPOINTS), 32),
        "head_b": jnp.zeros((NUM_KEYPOINTS,), jnp.float32),
        "fc_w": jnp.concatenate([w(ks[6], (feat_hw, dx), feat_hw),
                                 w(ks[7], (feat_hw, dy), feat_hw)],
                                axis=1).astype(jnp.bfloat16),
        "fc_b": jnp.zeros((dx + dy,), jnp.float32),
    }
    return p


def model_forward(x_nchw, p, *, row_chunk=16):
    B, _, H, W = x_nchw.shape
    x = jnp.transpose(x_nchw, (0, 2, 3, 1)).astype(jnp.float32)  # NCHW -> NHWC

    # ---- extract_feat (backbone) ----
    x = stem_conv(x, p["stem_w"], p["stem_b"])
    x = dw_pw_block(x, p["dw1_w"], p["dw1_b"], p["pw1_w"], p["pw1_b"],
                    stride=2, row_chunk=row_chunk)
    # dw2 + pw2 + head 1x1 conv fused in one kernel (backbone output never hits HBM)
    x = dw_pw_block(x, p["dw2_w"], p["dw2_b"], p["pw2_w"], p["pw2_b"],
                    stride=1, head_w=p["head_w"], head_b=p["head_b"],
                    row_chunk=row_chunk)

    # ---- head (SimCC, output_heatmaps=False -> (simcc_x, simcc_y)) ----
    Bf, Hf, Wf, K = x.shape
    # TODO(synk): 17-channel NHWC->NCHW transpose stays in XLA (tiny tensor);
    # folding it into the FC kernel would save one pass over the feature map.
    feats = jnp.transpose(x, (0, 3, 1, 2)).reshape(B * K, Hf * Wf)
    out = matmul_bias(feats, p["fc_w"], p["fc_b"])   # fused simcc_x|simcc_y GEMM
    dx, dy = W * SIMCC_SPLIT, H * SIMCC_SPLIT
    simcc_x = out[:, :dx].reshape(B, K, dx)
    simcc_y = out[:, dx:].reshape(B, K, dy)
    return simcc_x, simcc_y


# -----------------------------------------------------------------------------
# Pure-JAX/XLA reference (for correctness check only).  The FC is computed in
# bf16 x bf16 (f32 accumulate) to mirror the kernel's precision policy.
# -----------------------------------------------------------------------------
def reference_forward(x_nchw, p):
    hp = jax.lax.Precision.HIGHEST
    x = jnp.transpose(x_nchw, (0, 2, 3, 1)).astype(jnp.float32)

    def conv(y, w, b, stride, groups=1):
        return jax.lax.conv_general_dilated(
            y, w, (stride, stride), ((1, 1), (1, 1)),
            dimension_numbers=("NHWC", "HWIO", "NHWC"),
            feature_group_count=groups, precision=hp) + b

    y = jax.nn.relu(conv(x, p["stem_w"], p["stem_b"], 2))
    C = y.shape[-1]
    y = jax.nn.relu(conv(y, p["dw1_w"].reshape(3, 3, 1, C), p["dw1_b"], 2, groups=C))
    y = jax.nn.relu(jnp.dot(y, p["pw1_w"], precision=hp) + p["pw1_b"])
    C = y.shape[-1]
    y = jax.nn.relu(conv(y, p["dw2_w"].reshape(3, 3, 1, C), p["dw2_b"], 1, groups=C))
    y = jax.nn.relu(jnp.dot(y, p["pw2_w"], precision=hp) + p["pw2_b"])
    y = jnp.dot(y, p["head_w"], precision=hp) + p["head_b"]
    B, Hf, Wf, K = y.shape
    feats = jnp.transpose(y, (0, 3, 1, 2)).reshape(B * K, Hf * Wf)
    out = jnp.dot(feats.astype(jnp.bfloat16), p["fc_w"],
                  preferred_element_type=jnp.float32) + p["fc_b"]
    dx = x_nchw.shape[3] * SIMCC_SPLIT
    return out[:, :dx].reshape(B, K, dx), out[:, dx:].reshape(B, K, -1)


def _rel_max_err(got, want):
    return float(jnp.max(jnp.abs(got - want)) / (jnp.max(jnp.abs(want)) + 1e-12))


if __name__ == "__main__":
    key = jax.random.PRNGKey(0)
    kx, kp, ka, kb = jax.random.split(key, 4)

    # --- standalone check of the tiled matmul (exercises M/N/K tiling + padding) ---
    a = jax.random.normal(ka, (96, 200), jnp.float32)
    b = jax.random.normal(kb, (200, 160), jnp.float32)
    bias = jnp.linspace(-1.0, 1.0, 160, dtype=jnp.float32)
    got = matmul_bias(a, b, bias, tm=32, tn=128, tk=128)
    want = jnp.dot(a, b, precision=jax.lax.Precision.HIGHEST) + bias
    assert _rel_max_err(got, want) < 2e-2, "matmul_bias mismatch"

    # --- full model at a small shape (stand-in for torch.rand((1, 3, 256, 256))) ---
    x = jax.random.uniform(kx, (2, 3, 32, 32), jnp.float32)          # NCHW
    params = init_params(kp, in_hw=(32, 32))
    # row_chunk=4 exercises the multi-chunk spatial-tiling path at this small size.
    fwd = jax.jit(lambda xx, pp: model_forward(xx, pp, row_chunk=4))
    simcc_x, simcc_y = fwd(x, params)
    jax.block_until_ready((simcc_x, simcc_y))

    assert simcc_x.shape == (2, NUM_KEYPOINTS, 32 * SIMCC_SPLIT)
    assert simcc_y.shape == (2, NUM_KEYPOINTS, 32 * SIMCC_SPLIT)

    # --- numerical check against the pure-JAX reference ---
    rx, ry = reference_forward(x, params)
    assert _rel_max_err(simcc_x, rx) < 2e-2, "simcc_x mismatch"
    assert _rel_max_err(simcc_y, ry) < 2e-2, "simcc_y mismatch"

    print("KERNEL_OK")
</pallas_src>

<mosaic_0001>
module attributes {stable_mosaic.version = 11 : i64} {
  func.func @_matmul_bias_kernel(%arg0: i32, %arg1: i32, %arg2: i32, %arg3: memref<32x128xf32, #tpu.memory_space<vmem>>, %arg4: memref<128x128xf32, #tpu.memory_space<vmem>>, %arg5: memref<1x128xf32, #tpu.memory_space<vmem>>, %arg6: memref<32x128xf32, #tpu.memory_space<vmem>>, %arg7: memref<32x128xf32, #tpu.memory_space<vmem>>) attributes {dimension_semantics = [#tpu.dimension_semantics<parallel>, #tpu.dimension_semantics<parallel>, #tpu.dimension_semantics<arbitrary>], iteration_bounds = array<i64: 3, 2, 2>, scalar_prefetch = 0 : i64, scratch_operands = 1 : i64, tpu.core_type = #tpu.core_type<tc>, window_params = [{transform_indices = @transform_0, window_bounds = array<i64: 32, 128>}, {transform_indices = @transform_1, window_bounds = array<i64: 128, 128>}, {transform_indices = @transform_2, window_bounds = array<i64: 1, 128>}, {transform_indices = @transform_3, window_bounds = array<i64: 32, 128>}]} {
    %c0_i32 = arith.constant 0 : i32
    %0 = arith.cmpi eq, %arg2, %c0_i32 : i32
    %1 = arith.extui %0 : i1 to i32
    %c0_i32_0 = arith.constant 0 : i32
    %2 = arith.cmpi ne, %1, %c0_i32_0 : i32
    scf.if %2 {
      %cst_9 = arith.constant 0.000000e+00 : f32
      %12 = vector.broadcast %cst_9 : f32 to vector<32x128xf32>
      %c0_10 = arith.constant 0 : index
      %c0_11 = arith.constant 0 : index
      %13 = vector.load %arg7[%c0_10, %c0_11] : memref<32x128xf32, #tpu.memory_space<vmem>>, vector<32x128xf32>
      tpu.vector_store %arg7[%c0_10, %c0_11], %12 {strides = array<i32>} : memref<32x128xf32, #tpu.memory_space<vmem>>, vector<32x128xf32>,
    } else {
    }
    %c0 = arith.constant 0 : index
    %c0_1 = arith.constant 0 : index
    %3 = vector.load %arg3[%c0, %c0_1] : memref<32x128xf32, #tpu.memory_space<vmem>>, vector<32x128xf32>
    %c0_2 = arith.constant 0 : index
    %c0_3 = arith.constant 0 : index
    %4 = vector.load %arg4[%c0_2, %c0_3] : memref<128x128xf32, #tpu.memory_space<vmem>>, vector<128x128xf32>
    %c0_4 = arith.constant 0 : index
    %c0_5 = arith.constant 0 : index
    %5 = vector.load %arg7[%c0_4, %c0_5] : memref<32x128xf32, #tpu.memory_space<vmem>>, vector<32x128xf32>
    %cst = arith.constant dense<0.000000e+00> : vector<32x128xf32>
    %6 = tpu.matmul %3, %4, %cst {dimension_numbers = #tpu.dot_dimension_numbers<[1], [0], [0], [1], [0, 0, 1, 1], [], []>} : vector<32x128xf32>, vector<128x128xf32>, vector<32x128xf32> -> vector<32x128xf32>
    %7 = arith.addf %5, %6 : vector<32x128xf32>
    %c0_6 = arith.constant 0 : index
    %c0_7 = arith.constant 0 : index
    %8 = vector.load %arg7[%c0_6, %c0_7] : memref<32x128xf32, #tpu.memory_space<vmem>>, vector<32x128xf32>
    tpu.vector_store %arg7[%c0_6, %c0_7], %7 {strides = array<i32>} : memref<32x128xf32, #tpu.memory_space<vmem>>, vector<32x128xf32>,
    %c1_i32 = arith.constant 1 : i32
    %9 = arith.cmpi eq, %arg2, %c1_i32 : i32
    %10 = arith.extui %9 : i1 to i32
    %c0_i32_8 = arith.constant 0 : i32
    %11 = arith.cmpi ne, %10, %c0_i32_8 : i32
    scf.if %11 {
      %c0_9 = arith.constant 0 : index
      %c0_10 = arith.constant 0 : index
      %12 = vector.load %arg7[%c0_9, %c0_10] : memref<32x128xf32, #tpu.memory_space<vmem>>, vector<32x128xf32>
      %c0_11 = arith.constant 0 : index
      %c0_12 = arith.constant 0 : index
      %13 = vector.load %arg5[%c0_11, %c0_12] : memref<1x128xf32, #tpu.memory_space<vmem>>, vector<1x128xf32>
      %14 = vector.broadcast %13 : vector<1x128xf32> to vector<32x128xf32>
      %15 = arith.addf %12, %14 : vector<32x128xf32>
      %c0_13 = arith.constant 0 : index
      %c0_14 = arith.constant 0 : index
      %16 = vector.load %arg6[%c0_13, %c0_14] : memref<32x128xf32, #tpu.memory_space<vmem>>, vector<32x128xf32>
      tpu.vector_store %arg6[%c0_13, %c0_14], %15 {strides = array<i32>} : memref<32x128xf32, #tpu.memory_space<vmem>>, vector<32x128xf32>,
    } else {
    }
    return
  }
  func.func @transform_0(%arg0: i32, %arg1: i32, %arg2: i32) -> (i32, i32) {
    %c0_i32 = arith.constant 0 : i32
    return %arg0, %arg2 : i32, i32
  }
  func.func @transform_1(%arg0: i32, %arg1: i32, %arg2: i32) -> (i32, i32) {
    %c0_i32 = arith.constant 0 : i32
    return %arg2, %arg1 : i32, i32
  }
  func.func @transform_2(%arg0: i32, %arg1: i32, %arg2: i32) -> (i32, i32) {
    %c0_i32 = arith.constant 0 : i32
    %c0_i32_0 = arith.constant 0 : i32
    return %c0_i32, %arg1 : i32, i32
  }
  func.func @transform_3(%arg0: i32, %arg1: i32, %arg2: i32) -> (i32, i32) {
    %c0_i32 = arith.constant 0 : i32
    return %arg0, %arg1 : i32, i32
  }
}

</mosaic_0001>

<bundles_post_ra>
// kernel: tpu_custom_call.1
= control target key start
LH: loop header
LB: loop body
LE: loop exit
PB: predicated region body
PF: predicated region fallthrough
CT: control target
= control target key end

     0   :  { %s1546_s0 = inlined_call_operand.hbm [shape: f32[96,256], index: 0, kind: input, shape index: {}]   ;;  %s1547_s1 = inlined_call_operand.hbm [shape: f32[256,256], index: 1, kind: input, shape index: {}]   ;;  %s1548_s2 = inlined_call_operand.vmem [shape: f32[1,256], index: 2, kind: input, shape index: {}]   ;;  %s1549_s3 = inlined_call_operand.hbm [shape: f32[96,256], index: 3, kind: output, shape index: {}]  }
   0x1   :  { %1567 = sst [smem:[#allocation19_spill]] %s1546_s0 }
   0x2   :  { %1568 = sst [smem:[#allocation20_spill]] %s1547_s1 }
   0x3   :  { %1569 = sst [smem:[#allocation21_spill]] %s1549_s3 }
   0x4   :  { %8 = vsyncpa [#allocation4], 0 }
   0x5   :  { %10 = vsyncpa [#allocation4 + $0x1], 0 }
   0x6   :  { %11 = vsyncpa [#allocation7], 0 }
   0x7   :  { %13 = vsyncpa [#allocation7 + $0x1], 0 }
   0x8   :  { %14 = vsyncpa [#allocation5], 0 }
   0x9   :  { %16 = vsyncpa [#allocation5 + $0x1], 0  ;;  %s1113_s12 = smov 0   ;;  %s1115_s13 = smov 0  }
   0xa   :  { %s1117_s14 = smov 0   ;;  %s1119_s15 = smov 0  }
   0xb   :  { %s1121_s16 = smov 0   ;;  %s1123_s17 = smov 0  }
   0xc   :  { %s1125_s18 = smov 0   ;;  %s1127_s19 = smov 0  }
   0xd   :  { %s1129_s20 = smov 0   ;;  %s1131_s21 = smov 0  }
   0xe   :  { %s1133_s22 = smov 0   ;;  %s1135_s23 = smov 0  }
   0xf   :  { %s1137_s24 = smov 0   ;;  %s1139_s25 = smov 0  }
  0x10   :  { %s1141_s26 = smov 0   ;;  %s1143_s27 = smov 0  }
  0x11 LB: > { %1570 = sst [smem:[#allocation12_spill]] %s1057_s21  ;;  %s34_s28 = sadd.s32 1, %s1069_s24  ;;  %s1081_s27 = sphi %s1143_s27, %s22_s27   ;;  %s1077_s26 = sphi %s1141_s26, %s1611_s26   ;;  %s1073_s25 = sphi %s1139_s25, %s1624_s25   ;;  %s1069_s24 = sphi %s1137_s24, %s1623_s24   ;;  %s1065_s23 = sphi %s1135_s23, %s1608_s23   ;;  %s1061_s22 = sphi %s1133_s22, %s1622_s22   ;;  %s1057_s21 = sphi %s1131_s21, %s1621_s21   ;;  %s1053_s20 = sphi %s1129_s20, %s1620_s20   ;;  %s1049_s19 = sphi %s1127_s19, %s1619_s19   ;;  %s1045_s18 = sphi %s1125_s18, %s1618_s18   ;;  %s1041_s17 = sphi %s1123_s17, %s1617_s17   ;;  %s1037_s16 = sphi %s1121_s16, %s1616_s16   ;;  %s1033_s15 = sphi %s1119_s15, %s1615_s15   ;;  %s1029_s14 = sphi %s1117_s14, %s1614_s14   ;;  %s1025_s13 = sphi %s1115_s13, %s1613_s13   ;;  %s1021_s12 = sphi %s1113_s12, %s1612_s12  }
  0x12   : > { %1571 = sst [smem:[#allocation13_spill]] %s1065_s23  ;;  %s1550_s29 = sadd.s32 4294967295, %s1081_s27  }
  0x13   : > { %1572 = sst [smem:[#allocation14_spill]] %s1077_s26  ;;  %p1193_p0 = scmp.ge.s32.totalorder %s34_s28, 2 }
  0x14   : > { %p57_p1 = scmp.ne.s32.totalorder %s1053_s20, %s1049_s19  ;;  %p1554_p2 = scmp.eq.s32.totalorder %s1081_s27, 0 }
  0x15   : > { %s1626_s28 = smov (%p1193_p0, %s34_s28), 0  ;;  %p63_p3 = scmp.ne.s32.totalorder %s1049_s19, %s1045_s18 }
  0x16   : > { %1574 = sst [smem:[#allocation15_spill]] %s1626_s28  ;;  %p1209_p4 = scmp.eq.s32.totalorder %s1550_s29, 0 }
  0x17   : > { %s1215_s7 = ssub.s32 %s1069_s24, %s1626_s28  ;;  %p59_p5 = por %p1554_p2, %p57_p1 }
  0x18   : > { %s1575_s6 = scalar_select %p1209_p4, 1, 0 }
  0x19   : > { %p1221_p6 = por %p1209_p4, %p63_p3  ;;  %p1553_p7 = scmp.lt.s32.totalorder %s1081_s27, 12 }
  0x1a   : > { %s169_s9 = sand.u32 1, %s1053_s20   ;;  %s592_s11 = sshll.u32 %s1077_s26, 3 }
  0x1b   : > { %s1576_s8 = scalar_select %p1221_p6, 1, 0 }
  0x1c   : > { %s571_s10 = sshll.u32 %s169_s9, 5  ;;  %s179_s18 = sadd.s32 %s1069_s24, %s592_s11 }
  0x1d   : > { %s173_s5 = scalar_lea.vmem [#allocation3], %s571_s10  ;;  %s574_s29 = sshll.u32 %s179_s18, 7 }
  0x1e   : > { %s182_s4 = sshll.u32 %s173_s5, 4  ;;  %s1577_s0 = sld [smem:[#allocation19_spill]]  ;;  %s1229_s4 = int_to_ptr.vmem [resolvable:$true] %s182_s4 }
  0x1f   : > { %p1238_p8 = pnand %p1553_p7, %p59_p5  ;;  %s1242_s5 = scalar_lea.sflag [#allocation4], %s169_s9 }
  0x21   : > { %p857_p10 = pneg %p1238_p8 }
  0x24   : > { %s1234_s23 = scalar_lea.hbm %s1577_s0, %s574_s29  ;;  %s860_s29 = scalar_lea.hbm %s1577_s0, 3072 }
  0x25   : > { %s855_s10 = scalar_lea.hbm %s1234_s23, 512  ;;  %p861_p13 = scmp.lt.u32.totalorder %s1234_s23, %s1577_s0 }
  0x26   : > { %p856_p9 = scmp.ne.s32.totalorder %s1234_s23, %s855_s10  ;;  %p862_p1 = scmp.lt.u32.totalorder %s860_s29, %s855_s10 }
  0x27   : > { %p864_p5 = scmp.lt.u32.totalorder %s855_s10, %s1234_s23 }
  0x28   : > { %p858_p11 = pnand %p857_p10, %p856_p9  ;;  %p863_p3 = por %p862_p1, %p861_p13 }
  0x2a   : > { %p859_p12 = pneg %p858_p11  ;;  %p865_p7 = por %p864_p5, %p863_p3 }
  0x2c   : > { %p866_p2 = pnand %p865_p7, %p859_p12 }
  0x2e   : > { %869 = shalt.err (!%p866_p2)
}
  0x2f   : > { %s870_s9 = scalar_lea.vmem %s1229_s4, 512  ;;  %s1083_s3 = smov [#allocation3]  }
  0x30   : > { %p871_p9 = scmp.ne.s32.totalorder %s1229_s4, %s870_s9  ;;  %s875_s28 = sshll.u32 %s1083_s3, 4  ;;  %s876_s28 = int_to_ptr.vmem [resolvable:$false] %s875_s28 }
  0x31   : > { %s877_s11 = scalar_lea.vmem %s876_s28, 1024  ;;  %p878_p4 = scmp.lt.s32.totalorder %s1229_s4, %s876_s28 }
  0x32   : > { %p873_p11 = pnand %p871_p9, %p857_p10  ;;  %p879_p13 = scmp.lt.s32.totalorder %s877_s11, %s870_s9 }
  0x34   : > { %p874_p6 = pneg %p873_p11  ;;  %p880_p1 = por %p879_p13, %p878_p4 }
  0x36   : > { %p881_p3 = pnand %p880_p1, %p874_p6 }
  0x38   : > { %884 = shalt.err (!%p881_p3)
}
  0x39   : > { %s1557_s10 = smov 256   ;;  %s1558_s29 = smov 128  }
  0x3a   : > { %s1559_s18 = smov 8   ;;  %p579_p2 = scmp.ge.s32.totalorder %s1081_s27, 1 }
  0x3b   : > { %710 = dma.hbm_to_vmem [thread:$0]  (!%p1238_p8), %s1234_s23, 512, %s1229_s4, %s1242_s5, %s1557_s10, %s1558_s29, %s1559_s18  }
  0x3c   : > { %p219_p4 = scmp.lt.s32.totalorder %s1081_s27, 13  ;;  %s1579_s9 = sadd.s32 4294967295, %s1081_s27  }
  0x3d   : > { %p1277_p6 = scmp.eq.s32.totalorder %s1579_s9, 11  ;;  %s568_s21 = sadd.s32 4294967294, %s1081_s27  }
  0x3e   : > { %p1281_p7 = pnand %p579_p2, %p219_p4  ;;  %s37_s11 = sadd.s32 1, %s1073_s25 }
  0x3f   : > { %s1628_s11 = smov (!%p1193_p0, %s37_s11), %s1073_s25  ;;  %s78_s23 = sadd.s32 1, %s1041_s17 }
  0x40   : > { %p91_p8 = scmp.ne.s32.totalorder %s1037_s16, %s1033_s15  ;;  %p39_p10 = scmp.ge.s32.totalorder %s1628_s11, 2 }
  0x41   : > { %p85_p12 = scmp.ne.s32.totalorder %s1041_s17, %s1037_s16  ;;  %p1582_p5 = scmp.ne.s32.totalorder %s1575_s6, 0 }
  0x42   : > { %s132_s5 = sadd.s32 1, %s1029_s14  ;;  %s1630_s11 = smov (%p39_p10, %s1628_s11), 0 }
  0x43   : > { %p1297_p9 = por %p91_p8, %p1582_p5  ;;  %1584 = sst [smem:[#allocation16_spill]] %s1630_s11 }
  0x44   : > { %s1585_s9 = sadd.s32 1, %s1077_s26  ;;  %s74_s30 = ssub.s32 %s1073_s25, %s1630_s11 }
  0x45   : > { %s1583_s4 = scalar_select %p1297_p9, 1, 0 }
  0x46   : > { %s1632_s9 = smov (!%p39_p10, %s1585_s9), %s1077_s26  ;;  %p142_p0 = scmp.ne.s32.totalorder %s1029_s14, %s1025_s13 }
  0x47   : > { %p43_p11 = scmp.ge.s32.totalorder %s1632_s9, 3  ;;  %s75_s15 = sor.u32 %s74_s30, %s1215_s7 }
  0x48   : > { %p76_p13 = scmp.eq.s32.totalorder %s75_s15, 0  ;;  %p1314_p1 = por %p1277_p6, %p142_p0 }
  0x49   : > { %s1634_s9 = smov (%p43_p11, %s1632_s9), 0  ;;  %p148_p3 = scmp.ne.s32.totalorder %s1025_s13, %s1021_s12 }
  0x4a   : > { %s1586_s6 = scalar_select %p1314_p1, 1, 0 }
  0x4b   : > { %1588 = sst [smem:[#allocation18_spill]] %s1634_s9  ;;  %s45_s29 = ssub.s32 %s1077_s26, %s1634_s9 }
  0x4c   : > { %1587 = sst [smem:[#allocation17_spill]] %s1586_s6  ;;  %s47_s18 = sor.u32 %s1215_s7, %s45_s29 }
  0x4d   : > { %s1321_s10 = scalar_select %p76_p13, %s1041_s17, %s78_s23  }
  0x4e   : > { %s129_s0 = sor.u32 %s74_s30, %s45_s29  ;;  %p48_p2 = scmp.eq.s32.totalorder %s47_s18, 0 }
  0x4f   : > { %p130_p4 = scmp.eq.s32.totalorder %s129_s0, 0  ;;  %p149_p8 = scmp.eq.s32.totalorder %s568_s21, 11 }
  0x50   : > { %s192_s3 = sand.u32 1, %s1041_s17   ;;  %s1589_s15 = sadd.s32 1, %s1053_s20 }
  0x51   : > { %s1332_s11 = scalar_select %p48_p2, %s1053_s20, %s1589_s15  }
  0x52   : > { %s1335_s6 = scalar_select %p130_p4, %s1029_s14, %s132_s5  }
  0x53   : > { %p1590_p6 = scmp.eq.s32.totalorder %s1081_s27, 0  ;;  %p1342_p5 = por %p149_p8, %p148_p3 }
  0x54   : > { %s575_s9 = sshll.u32 %s192_s3, 7  ;;  %s593_s7 = sshll.u32 %s1069_s24, 5 }
  0x55   : > { %p87_p10 = por %p85_p12, %p1590_p6  ;;  %s202_s29 = sadd.s32 %s1073_s25, %s593_s7 }
  0x56   : > { %s1591_s23 = scalar_select %p1342_p5, 1, 0 }
  0x57   : > { %s578_s18 = sshll.u32 %s202_s29, 7  ;;  %s196_s30 = scalar_lea.vmem [#allocation6], %s575_s9 }
  0x58   : > { %s205_s0 = sshll.u32 %s196_s30, 4  ;;  %s1592_s1 = sld [smem:[#allocation20_spill]]  ;;  %s1353_s0 = int_to_ptr.vmem [resolvable:$true] %s205_s0 }
  0x59   : > { %p1593_p12 = scmp.lt.s32.totalorder %s1081_s27, 12  ;;  %s1361_s9 = scalar_lea.sflag [#allocation7], %s192_s3 }
  0x5b   : > { %p1357_p0 = pnand %p1593_p12, %p87_p10 }
  0x5d   : > { %p887_p13 = pneg %p1357_p0 }
  0x5e   : > { %s1351_s15 = scalar_lea.hbm %s1592_s1, %s578_s18  ;;  %s890_s18 = scalar_lea.hbm %s1592_s1, 8192 }
  0x5f   : > { %s885_s7 = scalar_lea.hbm %s1351_s15, 2048  ;;  %p891_p4 = scmp.lt.u32.totalorder %s1351_s15, %s1592_s1 }
  0x60   : > { %p886_p11 = scmp.ne.s32.totalorder %s1351_s15, %s885_s7  ;;  %p892_p8 = scmp.lt.u32.totalorder %s890_s18, %s885_s7 }
  0x61   : > { %p894_p10 = scmp.lt.u32.totalorder %s885_s7, %s1351_s15 }
  0x62   : > { %p888_p3 = pnand %p887_p13, %p886_p11  ;;  %p893_p6 = por %p892_p8, %p891_p4 }
  0x64   : > { %p889_p2 = pneg %p888_p3  ;;  %p895_p12 = por %p894_p10, %p893_p6 }
  0x66   : > { %p896_p5 = pnand %p895_p12, %p889_p2 }
  0x68   : > { %899 = shalt.err (!%p896_p5)
}
  0x69   : > { %s900_s3 = scalar_lea.vmem %s1353_s0, 2048  ;;  %s1087_s26 = smov [#allocation6]  }
  0x6a   : > { %p901_p11 = scmp.ne.s32.totalorder %s1353_s0, %s900_s3  ;;  %s905_s29 = sshll.u32 %s1087_s26, 4  ;;  %s906_s29 = int_to_ptr.vmem [resolvable:$false] %s905_s29 }
  0x6b   : > { %s907_s30 = scalar_lea.vmem %s906_s29, 4096  ;;  %p908_p9 = scmp.lt.s32.totalorder %s1353_s0, %s906_s29 }
  0x6c   : > { %p903_p3 = pnand %p901_p11, %p887_p13  ;;  %p909_p4 = scmp.lt.s32.totalorder %s907_s30, %s900_s3 }
  0x6e   : > { %p904_p1 = pneg %p903_p3  ;;  %p910_p8 = por %p909_p4, %p908_p9 }
  0x70   : > { %p911_p6 = pnand %p910_p8, %p904_p1 }
  0x72   : > { %914 = shalt.err (!%p911_p6)
}
  0x73   : > { %s1595_s7 = smov 8   ;;  %s1596_s18 = smov 128  }
  0x74   : > { %s1597_s21 = smov 256   ;;  %223 = sbr.rel (%p1281_p7) target bundleno = 437 (0x1b5), region = 32 }
  0x75   : > { %713 = dma.hbm_to_vmem [thread:$0]  (!%p1357_p0), %s1351_s15, 2048, %s1353_s0, %s1361_s9, %s1597_s21, %s1596_s18, %s1595_s7  }
  0x76   : > { %s225_s26 = sand.u32 (!%p1281_p7), 1, %s1049_s19   ;;  %p1598_p9 = scmp.ne.s32.totalorder (!%p1281_p7), %s1576_s8, 0 }
  0x77   : > { %s580_s29 = sshll.u32 (!%p1281_p7), %s225_s26, 5  ;;  %s226_s3 = scalar_lea.sflag (!%p1281_p7), [#allocation4], %s225_s26 }
  0x78   : > { %s1395_s30 = scalar_lea.vmem (!%p1281_p7), [#allocation3], %s580_s29 }
  0x7b   : > { %1008 = dma.done.wait (%p1598_p9), %s226_s3, 512  }
  0x7c   : > { %1010 = vsyncadd (%p1598_p9), %s226_s3, 4294966784  ;;  %s234_s5 = sand.u32 1, %s1037_s16   ;;  %p1599_p7 = scmp.ne.s32.totalorder %s1583_s4, 0 }
  0x7d   : > { %s581_s1 = sshll.u32 %s234_s5, 7  ;;  %s235_s0 = scalar_lea.sflag [#allocation7], %s234_s5 }
  0x7e   : > { %s1402_s15 = scalar_lea.vmem [#allocation6], %s581_s1 }
  0x7f   : > { %1012 = dma.done.wait (%p1599_p7), %s235_s0, 2048  }
  0x80   : > { %1014 = vsyncadd (%p1599_p7), %s235_s0, 4294965248  ;;  %s266_s28 = sand.u32 1, %s1025_s13   ;;  %p271_p1 = scmp.lt.s32.totalorder %s1061_s22, 1 }
  0x81   : > { %s582_s8 = sshll.u32 %s266_s28, 5  ;;  %s1600_s26 = sld [smem:[#allocation12_spill]] }
  0x82   : > { %s1413_s9 = scalar_select %p271_p1, %s1061_s22, 1 }
  0x83   : > { %s1419_s21 = scalar_lea.vmem [#allocation8], %s582_s8 }
  0x84   : > { %s273_s1 = scalar_lea.vmem %s1548_s2, %s1413_s9 }
  0x87   : > { %p583_p5 = scmp.ne.s32.totalorder %s1600_s26, 0 }
  0x88   : > { %v1088_v0 = vmov (!%p583_p5), 0.0  }
  0x89   : > { %278 = sbr.rel (%p583_p5) target bundleno = 144 (0x90), region = 44  ;;  %279 = vst [vmem:[#allocation2] sm:$0xff] (!%p583_p5), %v1088_v0  ;;  %280 = vst [vmem:[#allocation2 + $0x8] sm:$0xff] (!%p583_p5), %v1088_v0 }
  0x8a   : > { %281 = vst [vmem:[#allocation2 + $0x10] sm:$0xff] (!%p583_p5), %v1088_v0  ;;  %282 = vst [vmem:[#allocation2 + $0x18] sm:$0xff] (!%p583_p5), %v1088_v0 }
  0x90 PF: > { %v287_v1 = vld [vmem:[%s1402_s15] sm:$0xff]  ;;  %v288_v2 = vld [vmem:[%s1402_s15 + $0x8] sm:$0xff]  ;;  %v289_v3 = vld [vmem:[%s1402_s15 + $0x10] sm:$0xff]  ;;  %s1601_s4 = sld [smem:[#allocation12_spill]] }
  0x91   : > { %v653_v4 = vpack.c.bf16 %v288_v2, %v287_v1  ;;  %v290_v5 = vld [vmem:[%s1402_s15 + $0x18] sm:$0xff]  ;;  %v291_v7 = vld [vmem:[%s1402_s15 + $0x20] sm:$0xff]  ;;  %v292_v8 = vld [vmem:[%s1402_s15 + $0x28] sm:$0xff] }
  0x92   : > { %v657_v6 = vpack.c.bf16 %v290_v5, %v289_v3  ;;  %v661_v9 = vpack.c.bf16 %v292_v8, %v291_v7  ;;  %v283_v10 = vld [vmem:[%s1395_s30] sm:$0xff]  ;;  %v285_v11 = vld [vmem:[%s1395_s30 + $0x10] sm:$0xff]  ;;  %v294_v13 = vld [vmem:[%s1402_s15 + $0x38] sm:$0xff] }
  0x93   : > { %654 = vmatprep.subr.bf16.mxu0 %v653_v4  ;;  %685 = vmatprep.subr.bf16.mxu1 %v653_v4  ;;  %v293_v12 = vld [vmem:[%s1402_s15 + $0x30] sm:$0xff]  ;;  %v295_v15 = vld [vmem:[%s1402_s15 + $0x40] sm:$0xff]  ;;  %v296_v16 = vld [vmem:[%s1402_s15 + $0x48] sm:$0xff] }
  0x94   : > { %656 = vmatpush3.bf16.msra.mxu0 %v653_v4  ;;  %693 = vmatpush3.bf16.msra.mxu1 %v653_v4  ;;  %v665_v14 = vpack.c.bf16 %v294_v13, %v293_v12  ;;  %v669_v17 = vpack.c.bf16 %v296_v16, %v295_v15  ;;  %v297_v18 = vld [vmem:[%s1402_s15 + $0x50] sm:$0xff]  ;;  %v298_v19 = vld [vmem:[%s1402_s15 + $0x58] sm:$0xff]  ;;  %v299_v21 = vld [vmem:[%s1402_s15 + $0x60] sm:$0xff] }
  0x95   : > { %658 = vmatprep.subr.bf16.mxu0 %v657_v6  ;;  %686 = vmatprep.subr.bf16.mxu1 %v657_v6  ;;  %v673_v20 = vpack.c.bf16 %v298_v19, %v297_v18  ;;  %v300_v22 = vld [vmem:[%s1402_s15 + $0x68] sm:$0xff]  ;;  %v301_v24 = vld [vmem:[%s1402_s15 + $0x70] sm:$0xff]  ;;  %v302_v25 = vld [vmem:[%s1402_s15 + $0x78] sm:$0xff] }
  0x96   : > { %647 = vmatprep.mubr.f32.mxu0 %v283_v10  ;;  %650 = vmatprep.mubr.f32.mxu1 %v285_v11  ;;  %v677_v23 = vpack.c.bf16 %v300_v22, %v299_v21  ;;  %v681_v26 = vpack.c.bf16 %v302_v25, %v301_v24  ;;  %v284_v27 = vld [vmem:[%s1395_s30 + $0x8] sm:$0xff]  ;;  %v286_v28 = vld [vmem:[%s1395_s30 + $0x18] sm:$0xff]  ;;  %v303_v31 = vld [vmem:[#allocation2] sm:$0xff]  ;;  %p584_p0 = scmp.ne.s32.totalorder %s1601_s4, 1 }
  0x97   : > { %v304_v29 = vld [vmem:[#allocation2 + $0x8] sm:$0xff]  ;;  %v306_v30 = vld [vmem:[#allocation2 + $0x18] sm:$0xff]  ;;  %v305_v32 = vld [vmem:[#allocation2 + $0x10] sm:$0xff] }
  0x98   : > { %660 = vmatpush3.bf16.msra.mxu0 %v657_v6  ;;  %694 = vmatpush3.bf16.msra.mxu1 %v657_v6  ;;  %v585_v42 = vld [vmem:[%s273_s1] ss:$0 sm:$0xff] (!%p584_p0) }
  0x99   : > { %662 = vmatprep.subr.bf16.mxu0 %v661_v9  ;;  %687 = vmatprep.subr.bf16.mxu1 %v661_v9 }
  0x9c   : > { %664 = vmatpush3.bf16.msra.mxu0 %v661_v9  ;;  %695 = vmatpush3.bf16.msra.mxu1 %v661_v9 }
  0x9d   : > { %666 = vmatprep.subr.bf16.mxu0 %v665_v14  ;;  %688 = vmatprep.subr.bf16.mxu1 %v665_v14 }
  0xa0   : > { %668 = vmatpush3.bf16.msra.mxu0 %v665_v14  ;;  %696 = vmatpush3.bf16.msra.mxu1 %v665_v14 }
  0xa1   : > { %670 = vmatprep.subr.bf16.mxu0 %v669_v17  ;;  %689 = vmatprep.subr.bf16.mxu1 %v669_v17 }
  0xa4   : > { %672 = vmatpush3.bf16.msra.mxu0 %v669_v17  ;;  %697 = vmatpush3.bf16.msra.mxu1 %v669_v17 }
  0xa5   : > { %674 = vmatprep.subr.bf16.mxu0 %v673_v20  ;;  %690 = vmatprep.subr.bf16.mxu1 %v673_v20 }
  0xa8   : > { %676 = vmatpush3.bf16.msra.mxu0 %v673_v20  ;;  %698 = vmatpush3.bf16.msra.mxu1 %v673_v20 }
  0xa9   : > { %678 = vmatprep.subr.bf16.mxu0 %v677_v23  ;;  %691 = vmatprep.subr.bf16.mxu1 %v677_v23 }
  0xac   : > { %680 = vmatpush3.bf16.msra.mxu0 %v677_v23  ;;  %699 = vmatpush3.bf16.msra.mxu1 %v677_v23 }
  0xad   : > { %682 = vmatprep.subr.bf16.mxu0 %v681_v26  ;;  %692 = vmatprep.subr.bf16.mxu1 %v681_v26 }
  0xb0   : > { %684 = vmatpush3.bf16.msra.mxu0 %v681_v26  ;;  %700 = vmatpush3.bf16.msra.mxu1 %v681_v26 }
  0xb3   : > { %648 = vmatmul.mubr.f32.vlgmr.msra.gmra.mrb[0].mxu0 %v284_v27  ;;  %651 = vmatmul.mubr.f32.vlgmr.msra.gmra.mrb[0].mxu1 %v286_v28 }
 0x184   : > { %403 = sbr.rel (%p584_p0) target bundleno = 405 (0x195), region = 48 }
 0x186   : > { %v649_v33 = vpop.f32.mrb[0].mxu0  ;;  %v652_v34 = vpop.f32.mrb[0].mxu1 }
 0x187   : > { %v393_v35 = vadd.f32 %v649_v33, %v304_v29  ;;  %v395_v36 = vadd.f32 %v652_v34, %v306_v30  ;;  %v373_v37 = vpop.f32.mrb[1].mxu0  ;;  %v383_v38 = vpop.f32.mrb[1].mxu1 }
 0x188   : > { %v392_v39 = vadd.f32 %v373_v37, %v303_v31  ;;  %v394_v40 = vadd.f32 %v383_v38, %v305_v32 }
 0x189   : > { %397 = vst [vmem:[#allocation2 + $0x8] sm:$0xff] %v393_v35  ;;  %399 = vst [vmem:[#allocation2 + $0x18] sm:$0xff] %v395_v36 }
 0x18a   : > { %396 = vst [vmem:[#allocation2] sm:$0xff] %v392_v39  ;;  %398 = vst [vmem:[#allocation2 + $0x10] sm:$0xff] %v394_v40 }
 0x190   : > { %v405_v43 = vld [vmem:[#allocation2 + $0x8] sm:$0xff]  ;;  %v407_v47 = vld [vmem:[#allocation2 + $0x18] sm:$0xff] }
 0x191   : > { %v404_v41 = vld [vmem:[#allocation2] sm:$0xff]  ;;  %v416_v45 = vadd.f32 %v585_v42, %v405_v43  ;;  %v406_v46 = vld [vmem:[#allocation2 + $0x10] sm:$0xff]  ;;  %v418_v49 = vadd.f32 %v585_v42, %v407_v47 }
 0x192   : > { %v415_v44 = vadd.f32 %v585_v42, %v404_v41  ;;  %v417_v48 = vadd.f32 %v585_v42, %v406_v46 }
 0x193   : > { %420 = vst [vmem:[%s1419_s21 + $0x8] sm:$0xff] %v416_v45  ;;  %422 = vst [vmem:[%s1419_s21 + $0x18] sm:$0xff] %v418_v49 }
 0x194   : > { %419 = vst [vmem:[%s1419_s21] sm:$0xff] %v415_v44  ;;  %421 = vst [vmem:[%s1419_s21 + $0x10] sm:$0xff] %v417_v48 }
 0x195 PF: > { %s1602_s30 = sld [smem:[#allocation13_spill]]  ;;  %s1603_s5 = sld [smem:[#allocation17_spill]] }
 0x196   : > { %s439_s8 = sshll.u32 %s1419_s21, 4  ;;  %s1604_s1 = sld [smem:[#allocation21_spill]]  ;;  %s1455_s8 = int_to_ptr.vmem [resolvable:$true] %s439_s8 }
 0x197   : > { %s1464_s4 = scalar_lea.sflag [#allocation5], %s266_s28  ;;  %s915_s29 = scalar_lea.vmem %s1455_s8, 512 }
 0x198   : > { %p916_p13 = scmp.ne.s32.totalorder %s1455_s8, %s915_s29 }
 0x19b   : > { %s594_s0 = sshll.u32 %s1602_s30, 3  ;;  %p1605_p2 = scmp.ne.s32.totalorder %s1603_s5, 0 }
 0x19c   : > { %s436_s15 = sadd.s32 %s1061_s22, %s594_s0  ;;  %s1089_s22 = smov [#allocation8]  }
 0x19d   : > { %s589_s9 = sshll.u32 %s436_s15, 7  ;;  %p917_p10 = pnand %p916_p13, %p1605_p2 }
 0x19e   : > { %s1460_s26 = scalar_lea.hbm %s1604_s1, %s589_s9  ;;  %s919_s21 = sshll.u32 %s1089_s22, 4  ;;  %s920_s21 = int_to_ptr.vmem [resolvable:$false] %s919_s21 }
 0x19f   : > { %p918_p12 = pneg %p917_p10  ;;  %s921_s3 = scalar_lea.vmem %s920_s21, 1024 }
 0x1a0   : > { %p922_p11 = scmp.lt.s32.totalorder %s1455_s8, %s920_s21  ;;  %p923_p3 = scmp.lt.s32.totalorder %s921_s3, %s915_s29 }
 0x1a2   : > { %p924_p4 = por %p923_p3, %p922_p11 }
 0x1a4   : > { %p925_p8 = pnand %p924_p4, %p918_p12 }
 0x1a6   : > { %928 = shalt.err (!%p925_p8)
}
 0x1a7   : > { %s929_s28 = scalar_lea.hbm %s1460_s26, 512  ;;  %s933_s15 = scalar_lea.hbm %s1604_s1, 3072 }
 0x1a8   : > { %p930_p6 = scmp.ne.s32.totalorder %s1460_s26, %s929_s28  ;;  %p934_p1 = scmp.lt.u32.totalorder %s1460_s26, %s1604_s1 }
 0x1a9   : > { %p935_p5 = scmp.lt.u32.totalorder %s933_s15, %s929_s28  ;;  %p937_p13 = scmp.lt.u32.totalorder %s929_s28, %s1460_s26 }
 0x1aa   : > { %p931_p9 = pnand %p930_p6, %p1605_p2 }
 0x1ab   : > { %p936_p0 = por %p935_p5, %p934_p1 }
 0x1ac   : > { %p932_p7 = pneg %p931_p9 }
 0x1ad   : > { %p938_p10 = por %p937_p13, %p936_p0 }
 0x1af   : > { %p939_p12 = pnand %p938_p10, %p932_p7 }
 0x1b1   : > { %942 = shalt.err (!%p939_p12)
}
 0x1b2   : > { %s1090_s18 = smov 128   ;;  %s1091_s29 = smov 256  }
 0x1b3   : > { %s1092_s22 = smov 8  }
 0x1b4   : > { %705 = dma.vmem_to_hbm [thread:$0]  (%p1605_p2), %s1455_s8, 512, %s1460_s26, %s1464_s4, %s1090_s18, %s1091_s29, %s1092_s22  }
 0x1b5 PF: > { %p719_p11 = scmp.ge.s32.totalorder %s1081_s27, 2  ;;  %s454_s21 = sand.u32 1, %s1021_s12  }
 0x1b6   : > { %p1606_p3 = scmp.ne.s32.totalorder %s1591_s23, 0  ;;  %s455_s3 = scalar_lea.sflag [#allocation5], %s454_s21 }
 0x1b8   : > { %p715_p4 = pnand %p719_p11, %p1606_p3 }
 0x1ba   : > { %1016 = dma.done.wait (!%p715_p4), %s455_s3, 512  }
 0x1bb   : > { %1018 = vsyncadd (!%p715_p4), %s455_s3, 4294966784  ;;  %s22_s27 = sadd.s32 1, %s1081_s27   ;;  %s1608_s23 = sld [smem:[#allocation14_spill]] }
 0x1bc   : > { %p1493_p8 = scmp.ge.s32.totalorder %s22_s27, 14   ;;  %s1609_s5 = sld [smem:[#allocation15_spill]] }
 0x1bd   : > { %s1610_s8 = sld [smem:[#allocation16_spill]]  ;;  %s1611_s26 = sld [smem:[#allocation18_spill]] }
 0x1be   : > { %s1612_s12 = smov %s1025_s13  ;;  %s1613_s13 = smov %s1029_s14 }
 0x1bf   : > { %s1614_s14 = smov %s1335_s6  ;;  %s1615_s15 = smov %s1037_s16 }
 0x1c0   : > { %s1616_s16 = smov %s1041_s17  ;;  %s1617_s17 = smov %s1321_s10 }
 0x1c1   : > { %s1618_s18 = smov %s1049_s19  ;;  %s1619_s19 = smov %s1053_s20 }
 0x1c2   : > { %s1620_s20 = smov %s1332_s11  ;;  %s1621_s21 = smov %s1069_s24 }
 0x1c3   : > { %s1622_s22 = smov %s1073_s25  ;;  %s1623_s24 = smov %s1609_s5 }
 0x1c4   : > { %s1624_s25 = smov %s1610_s8  ;;  %21 = sbr.rel (!%p1493_p8) target bundleno = 17 (0x11), region = 101 }
 0x1cb   :  { %460 = vsyncpa [#allocation4], 1 }
 0x1cc   :  { %462 = vsyncpa [#allocation4 + $0x1], 1 }
 0x1cd   :  { %463 = vsyncpa [#allocation7], 1 }
 0x1ce   :  { %465 = vsyncpa [#allocation7 + $0x1], 1 }
 0x1cf   :  { %466 = vsyncpa [#allocation5], 1 }
 0x1d0   :  { %468 = vsyncpa [#allocation5 + $0x1], 1 }

</bundles_post_ra>
